<compile_context>
chip_gen: v6e
topology: v6e:2x2x1
jax: 0.10.0
libtpu: 0.0.40
codegen_flags: <defaults>
</compile_context>

<pallas_src>
import functools

import jax
import jax.numpy as jnp
from jax.experimental import pallas as pl
from jax.experimental.pallas import tpu as pltpu

_LANE = 128


def _batchnorm_kernel(x_ref, gamma_ref, beta_ref, o_ref, *, eps, n_batch):
    # Full batch for this neuron tile is resident in VMEM; the reduction over
    # the batch dimension happens entirely inside the kernel.
    x = x_ref[...].astype(jnp.float32)                         # (B, TN)
    inv_n = jnp.float32(1.0 / n_batch)

    mu = jnp.sum(x, axis=0, keepdims=True) * inv_n             # (1, TN)
    diff = x - mu                                              # (B, TN)
    var = jnp.sum(diff * diff, axis=0, keepdims=True) * inv_n  # biased var

    inv_std = jax.lax.rsqrt(var + jnp.float32(eps))            # (1, TN), EUP
    scale = gamma_ref[...] * inv_std                           # (1, TN)
    shift = beta_ref[...] - mu * scale                         # (1, TN)

    # gamma*(x-mu)*inv_std + beta == x*scale + shift
    o_ref[...] = (x * scale + shift).astype(o_ref.dtype)


def _pick_tile_n(n_neurons, n_batch, itemsize, max_block_bytes=2 * 1024 * 1024):
    """Pick the neuron-tile width.

    If n_neurons < 128, use the full lane extent (block dim == array dim is
    allowed, no padding needed).  Otherwise use the largest multiple of 128
    that keeps one (n_batch, TN) block within the byte budget; the grid uses
    cdiv so TN need not divide n_neurons.
    """
    if n_neurons <= _LANE:
        return n_neurons
    n_up = ((n_neurons + _LANE - 1) // _LANE) * _LANE
    cap = (max_block_bytes // max(1, n_batch * itemsize)) // _LANE * _LANE
    return max(_LANE, min(cap, n_up))


def custom_batchnorm(x, gamma, beta, eps=1e-5):
    """Batch-norm forward. x: (n_batch, n_neurons), gamma/beta: (n_neurons,)."""
    assert x.ndim == 2
    n_batch, n_neurons = x.shape
    assert gamma.shape == (n_neurons,) and beta.shape == (n_neurons,)

    gamma2d = gamma.reshape(1, n_neurons).astype(jnp.float32)
    beta2d = beta.reshape(1, n_neurons).astype(jnp.float32)

    itemsize = jnp.dtype(x.dtype).itemsize
    tn = _pick_tile_n(n_neurons, n_batch, max(itemsize, 4))
    grid = (pl.cdiv(n_neurons, tn),)
    # TODO(synk): for n_batch so large that a single (n_batch, TN=128) f32
    # block exceeds VMEM, a two-pass batch-tiled variant (accumulate
    # sum/sumsq, then apply scale/shift) would be needed; not required for
    # MLP-sized batches.

    kernel = functools.partial(_batchnorm_kernel, eps=float(eps),
                               n_batch=n_batch)

    out = pl.pallas_call(
        kernel,
        out_shape=jax.ShapeDtypeStruct((n_batch, n_neurons), x.dtype),
        grid=grid,
        in_specs=[
            pl.BlockSpec((n_batch, tn), lambda j: (0, j)),
            pl.BlockSpec((1, tn), lambda j: (0, j)),
            pl.BlockSpec((1, tn), lambda j: (0, j)),
        ],
        out_specs=pl.BlockSpec((n_batch, tn), lambda j: (0, j)),
        compiler_params=pltpu.CompilerParams(
            dimension_semantics=("parallel",),
            vmem_limit_bytes=32 * 1024 * 1024,
        ),
        cost_estimate=pl.CostEstimate(
            flops=7 * n_batch * n_neurons,
            transcendentals=n_neurons,
            bytes_accessed=2 * n_batch * n_neurons * itemsize + 8 * n_neurons,
        ),
    )(x, gamma2d, beta2d)

    return out


def _reference_batchnorm(x, gamma, beta, eps=1e-5):
    mu = jnp.mean(x, axis=0)
    var = jnp.var(x, axis=0)  # biased (ddof=0), matches unbiased=False
    x_hat = (x - mu) / jnp.sqrt(var + eps)
    return gamma * x_hat + beta


if __name__ == "__main__":
    n_batch, n_neurons = 8, 32
    key = jax.random.PRNGKey(0)
    x = jax.random.normal(key, (n_batch, n_neurons), dtype=jnp.float32)

    # Deterministic parameter init matching the module's __init__:
    # gamma = ones(n_neurons), beta = zeros(n_neurons)
    gamma = jnp.ones((n_neurons,), dtype=jnp.float32)
    beta = jnp.zeros((n_neurons,), dtype=jnp.float32)

    out = custom_batchnorm(x, gamma, beta, eps=1e-5)
    out = jax.block_until_ready(out)

    ref = _reference_batchnorm(x, gamma, beta, eps=1e-5)
    assert out.shape == (n_batch, n_neurons)
    assert jnp.allclose(out, ref, atol=1e-5, rtol=1e-5)

    print("KERNEL_OK")
</pallas_src>

<mosaic_0001>
module attributes {stable_mosaic.version = 11 : i64} {
  func.func @_batchnorm_kernel(%arg0: i32, %arg1: memref<8x32xf32, #tpu.memory_space<vmem>>, %arg2: memref<1x32xf32, #tpu.memory_space<vmem>>, %arg3: memref<1x32xf32, #tpu.memory_space<vmem>>, %arg4: memref<8x32xf32, #tpu.memory_space<vmem>>) attributes {dimension_semantics = [#tpu.dimension_semantics<parallel>], iteration_bounds = array<i64: 1>, scalar_prefetch = 0 : i64, scratch_operands = 0 : i64, tpu.core_type = #tpu.core_type<tc>, window_params = [{transform_indices = @transform_0, window_bounds = array<i64: 8, 32>}, {transform_indices = @transform_1, window_bounds = array<i64: 1, 32>}, {transform_indices = @transform_2, window_bounds = array<i64: 1, 32>}, {transform_indices = @transform_3, window_bounds = array<i64: 8, 32>}]} {
    %c0 = arith.constant 0 : index
    %c0_0 = arith.constant 0 : index
    %0 = vector.load %arg1[%c0, %c0_0] : memref<8x32xf32, #tpu.memory_space<vmem>>, vector<8x32xf32>
    %cst = arith.constant dense<0.000000e+00> : vector<32xf32>
    %1 = vector.multi_reduction <add>, %0, %cst [0] : vector<8x32xf32> to vector<32xf32>
    %2 = vector.shape_cast %1 : vector<32xf32> to vector<1x32xf32>
    %cst_1 = arith.constant 1.250000e-01 : f32
    %3 = vector.broadcast %cst_1 : f32 to vector<1x32xf32>
    %4 = arith.mulf %2, %3 : vector<1x32xf32>
    %5 = vector.broadcast %4 : vector<1x32xf32> to vector<8x32xf32>
    %6 = arith.subf %0, %5 : vector<8x32xf32>
    %7 = arith.mulf %6, %6 : vector<8x32xf32>
    %cst_2 = arith.constant dense<0.000000e+00> : vector<32xf32>
    %8 = vector.multi_reduction <add>, %7, %cst_2 [0] : vector<8x32xf32> to vector<32xf32>
    %9 = vector.shape_cast %8 : vector<32xf32> to vector<1x32xf32>
    %cst_3 = arith.constant 1.250000e-01 : f32
    %10 = vector.broadcast %cst_3 : f32 to vector<1x32xf32>
    %11 = arith.mulf %9, %10 : vector<1x32xf32>
    %cst_4 = arith.constant 9.99999974E-6 : f32
    %12 = vector.broadcast %cst_4 : f32 to vector<1x32xf32>
    %13 = arith.addf %11, %12 : vector<1x32xf32>
    %14 = math.rsqrt %13 : vector<1x32xf32>
    %c0_5 = arith.constant 0 : index
    %c0_6 = arith.constant 0 : index
    %15 = vector.load %arg2[%c0_5, %c0_6] : memref<1x32xf32, #tpu.memory_space<vmem>>, vector<1x32xf32>
    %16 = arith.mulf %15, %14 : vector<1x32xf32>
    %c0_7 = arith.constant 0 : index
    %c0_8 = arith.constant 0 : index
    %17 = vector.load %arg3[%c0_7, %c0_8] : memref<1x32xf32, #tpu.memory_space<vmem>>, vector<1x32xf32>
    %18 = arith.mulf %4, %16 : vector<1x32xf32>
    %19 = arith.subf %17, %18 : vector<1x32xf32>
    %20 = vector.broadcast %16 : vector<1x32xf32> to vector<8x32xf32>
    %21 = arith.mulf %0, %20 : vector<8x32xf32>
    %22 = vector.broadcast %19 : vector<1x32xf32> to vector<8x32xf32>
    %23 = arith.addf %21, %22 : vector<8x32xf32>
    %c0_9 = arith.constant 0 : index
    %c0_10 = arith.constant 0 : index
    %24 = vector.load %arg4[%c0_9, %c0_10] : memref<8x32xf32, #tpu.memory_space<vmem>>, vector<8x32xf32>
    tpu.vector_store %arg4[%c0_9, %c0_10], %23 {strides = array<i32>} : memref<8x32xf32, #tpu.memory_space<vmem>>, vector<8x32xf32>,
    return
  }
  func.func @transform_0(%arg0: i32) -> (i32, i32) {
    %c0_i32 = arith.constant 0 : i32
    %c0_i32_0 = arith.constant 0 : i32
    return %c0_i32, %arg0 : i32, i32
  }
  func.func @transform_1(%arg0: i32) -> (i32, i32) {
    %c0_i32 = arith.constant 0 : i32
    %c0_i32_0 = arith.constant 0 : i32
    return %c0_i32, %arg0 : i32, i32
  }
  func.func @transform_2(%arg0: i32) -> (i32, i32) {
    %c0_i32 = arith.constant 0 : i32
    %c0_i32_0 = arith.constant 0 : i32
    return %c0_i32, %arg0 : i32, i32
  }
  func.func @transform_3(%arg0: i32) -> (i32, i32) {
    %c0_i32 = arith.constant 0 : i32
    %c0_i32_0 = arith.constant 0 : i32
    return %c0_i32, %arg0 : i32, i32
  }
}

</mosaic_0001>

<bundles_post_ra>
// kernel: tpu_custom_call.1
= control target key start
LH: loop header
LB: loop body
LE: loop exit
PB: predicated region body
PF: predicated region fallthrough
CT: control target
= control target key end

     0   :  { %8 = vsyncpa [#allocation3], 0  ;;  %s169_s0 = inlined_call_operand.hbm [shape: f32[8,32], index: 0, kind: input, shape index: {}]   ;;  %s170_s1 = inlined_call_operand.vmem [shape: f32[1,32], index: 1, kind: input, shape index: {}]   ;;  %s171_s2 = inlined_call_operand.vmem [shape: f32[1,32], index: 2, kind: input, shape index: {}]   ;;  %s172_s3 = inlined_call_operand.hbm [shape: f32[8,32], index: 3, kind: output, shape index: {}]  }
   0x1   :  { %9 = vsyncpa [#allocation4], 0  ;;  %s132_s12 = smov [#allocation2]  }
   0x2   :  { %s16_s13 = sshll.u32 %s132_s12, 4  ;;  %s17_s13 = int_to_ptr.vmem [resolvable:$true] %s16_s13 }
   0x3   :  { %s96_s14 = scalar_lea.vmem %s17_s13, 128  ;;  %p101_p1 = scmp.lt.s32.totalorder %s17_s13, %s17_s13 }
   0x4   :  { %p97_p0 = scmp.ne.s32.totalorder %s17_s13, %s96_s14  ;;  %p102_p2 = scmp.lt.s32.totalorder %s96_s14, %s96_s14 }
   0x6   :  { %p103_p3 = por %p102_p2, %p101_p1 }
   0x8   :  { %p104_p4 = pnand %p103_p3, %p97_p0 }
   0xa   :  { %107 = shalt.err (!%p104_p4)
}
   0xb   :  { %19 = dma.hbm_to_vmem [thread:$0]  %s169_s0, 128, %s17_s13, [#allocation3]  }
   0xc   :  { %128 = dma.done.wait [#allocation3], 128  }
   0xd   :  { %129 = vsyncadd [#allocation3], 4294967168  ;;  %vm28_vm0 = vcmask 261120   ;;  %v27_v0 = vld [vmem:[#allocation2] sm:$0xff]  ;;  %v55_v20 = vlaneseq  ;;  %s133_s20 = smov [#allocation5]  }
   0xe   :  { %v29_v1 = vsel %vm28_vm0, %v27_v0, 0.0  ;;  %v49_v22 = vld [vmem:[%s170_s1] sm:$0x1]  ;;  %s75_s21 = sshll.u32 %s133_s20, 4  ;;  %s76_s21 = int_to_ptr.vmem [resolvable:$true] %s75_s21 }
   0xf   :  { %v30_v2 = vrot.slane %v29_v1, 4  ;;  %v56_v21 = vshrl.u32 %v55_v20, 7  ;;  %v51_v26 = vld [vmem:[%s171_s2] sm:$0x1]  ;;  %s108_s22 = scalar_lea.vmem %s76_s21, 128  ;;  %p113_p6 = scmp.lt.s32.totalorder %s76_s21, %s76_s21 }
  0x10   :  { %p109_p5 = scmp.ne.s32.totalorder %s76_s21, %s108_s22  ;;  %p114_p7 = scmp.lt.s32.totalorder %s108_s22, %s108_s22 }
  0x11   :  { %v31_v3 = vadd.f32 %v30_v2, %v29_v1  ;;  %v57_v23 = vsub.s32 0, %v56_v21 }
  0x12   :  { %p115_p8 = por %p114_p7, %p113_p6 }
  0x13   :  { %v32_v4 = vrot.slane %v31_v3, 2 }
  0x14   :  { %p116_p9 = pnand %p115_p8, %p109_p5 }
  0x15   :  { %v33_v5 = vadd.f32 %v32_v4, %v31_v3 }
  0x17   :  { %v34_v6 = vrot.slane %v33_v5, 1 }
  0x19   :  { %v35_v7 = vadd.f32 %v34_v6, %v33_v5 }
  0x1b   :  { %v36_v8 = vmul.f32 0.125, %v35_v7 }
  0x1d   :  { %v37_v9 = vsub.f32 %v27_v0, %v36_v8 }
  0x1f   :  { %v38_v10 = vmul.f32 %v37_v9, %v37_v9 }
  0x21   :  { %v39_v11 = vsel %vm28_vm0, %v38_v10, 0.0 }
  0x22   :  { %v40_v12 = vrot.slane %v39_v11, 4 }
  0x24   :  { %v41_v13 = vadd.f32 %v40_v12, %v39_v11 }
  0x26   :  { %v42_v14 = vrot.slane %v41_v13, 2 }
  0x28   :  { %v43_v15 = vadd.f32 %v42_v14, %v41_v13 }
  0x2a   :  { %v44_v16 = vrot.slane %v43_v15, 1 }
  0x2c   :  { %v45_v17 = vadd.f32 %v44_v16, %v43_v15 }
  0x2e   :  { %v46_v18 = vmul.f32 0.125, %v45_v17 }
  0x30   :  { %v47_v19 = vadd.f32 1e-05, %v46_v18 }
  0x32   :  { %86 = vrsqrt.f32 %v47_v19 }
  0x3f   :  { %v87_v24 = vpop.eup %86 }
  0x40   :  { %v50_v25 = vmul.f32 %v87_v24, %v49_v22 }
  0x42   :  { %v52_v27 = vmul.f32 %v50_v25, %v36_v8  ;;  %v58_v28 = vrot.slane %v50_v25, %v57_v23 }
  0x44   :  { %v53_v29 = vsub.f32 %v51_v26, %v52_v27  ;;  %v60_v30 = vmul.f32 %v58_v28, %v27_v0 }
  0x46   :  { %v65_v31 = vrot.slane %v53_v29, %v57_v23 }
  0x48   :  { %v67_v32 = vadd.f32 %v65_v31, %v60_v30 }
  0x4a   :  { %68 = vst.msk [vmem:[#allocation5] sm:$0xff] %vm28_vm0, %v67_v32 }
  0x4b   :  { %119 = shalt.err (!%p116_p9)
}
  0x4c   :  { %78 = dma.vmem_to_hbm [thread:$0]  %s76_s21, 128, %s172_s3, [#allocation4]  }
  0x4d   :  { %130 = dma.done.wait [#allocation4], 128  }
  0x4e   :  { %131 = vsyncadd [#allocation4], 4294967168 }
  0x4f   :  { %82 = vsyncpa [#allocation3], 1 }
  0x50   :  { %83 = vsyncpa [#allocation4], 1 }

</bundles_post_ra>
